<compile_context>
chip_gen: v6e
topology: v6e:2x2x1
jax: 0.10.0
libtpu: 0.0.40
codegen_flags: <defaults>
</compile_context>

<pallas_src>
import math
from functools import partial

import numpy as np
import jax
import jax.numpy as jnp
from jax.experimental import pallas as pl
from jax.experimental.pallas import tpu as pltpu


# ----------------------------------------------------------------------------
# In-kernel helpers
# ----------------------------------------------------------------------------
def _bf16(x):
    return x.astype(jnp.bfloat16)


def _erf(x):
    # Abramowitz & Stegun 7.1.26 polynomial approximation of erf (max err ~1.5e-7).
    # TODO(synk): Mosaic has no guaranteed lowering for lax.erf; this approximates
    # PyTorch's exact (erf-based) GELU to ~float32 precision.
    a1, a2, a3, a4, a5 = 0.254829592, -0.284496736, 1.421413741, -1.453152027, 1.061405429
    p = 0.3275911
    s = jnp.sign(x)
    ax = jnp.abs(x)
    t = 1.0 / (1.0 + p * ax)
    poly = ((((a5 * t + a4) * t + a3) * t + a2) * t + a1) * t
    return s * (1.0 - poly * jnp.exp(-ax * ax))


def _gelu(x):
    return 0.5 * x * (1.0 + _erf(x * (1.0 / math.sqrt(2.0))))


def _ln_f32(x, g, b):
    mu = jnp.mean(x, axis=-1, keepdims=True)
    xc = x - mu
    var = jnp.mean(xc * xc, axis=-1, keepdims=True)
    return xc * jax.lax.rsqrt(var + 1e-5) * g + b


# ----------------------------------------------------------------------------
# Pallas kernels (fused sublayers)
# ----------------------------------------------------------------------------
def _ln_matmul_kernel(x_ref, g_ref, b_ref, w_ref, bias_ref, o_ref, h_ref):
    # o = LN(x) @ W + bias.  LN(x) (and the bf16 cast) is computed only once per
    # row tile (at the first output-column step) and cached in a VMEM scratch.
    @pl.when(pl.program_id(1) == 0)
    def _():
        h_ref[...] = _bf16(_ln_f32(x_ref[...], g_ref[...], b_ref[...]))

    o_ref[...] = (jnp.dot(h_ref[...], w_ref[...],
                          preferred_element_type=jnp.float32)
                  + bias_ref[...]).astype(o_ref.dtype)


def _attn_kernel(xres_ref, q_ref, k_ref, v_ref, wp_ref, bp_ref, o_ref, *,
                 n_head, head_dim, scale):
    # Grid step = (batch element, query tile).  q:(1,tq,C) bf16, k/v:(1,T,C) bf16.
    # Per-head attention, accumulated straight into the output projection
    # (no head concatenation, no per-head lane-narrow stores).
    qi = pl.program_id(1)
    xres = xres_ref[0]                              # (tq, C)  f32
    qh = q_ref[0]                                   # (tq, C)  bf16
    kh = k_ref[0]                                   # (T,  C)  bf16
    vh = v_ref[0]                                   # (T,  C)  bf16
    tq = qh.shape[0]
    T = kh.shape[0]
    C = n_head * head_dim

    # Causal mask for this query tile (global query row = qi*tq + local row).
    row = jax.lax.broadcasted_iota(jnp.int32, (tq, T), 0) + qi * tq
    col = jax.lax.broadcasted_iota(jnp.int32, (tq, T), 1)
    causal = row >= col

    acc = jnp.zeros((tq, C), jnp.float32)
    for h in range(n_head):
        lo = h * head_dim
        q = qh[:, lo:lo + head_dim]
        k = kh[:, lo:lo + head_dim]
        v = vh[:, lo:lo + head_dim]
        s = jax.lax.dot_general(q, k, (((1,), (1,)), ((), ())),
                                preferred_element_type=jnp.float32) * scale
        s = jnp.where(causal, s, -jnp.inf)
        m = jnp.max(s, axis=-1, keepdims=True)
        p = jnp.exp(s - m)
        # Exact normalization (approx EUP reciprocal was the source of the
        # amplified mismatch through the memory layer).
        p = p / jnp.sum(p, axis=-1, keepdims=True)
        pv = jnp.dot(_bf16(p), v, preferred_element_type=jnp.float32)   # (tq, hd)
        acc = acc + jnp.dot(_bf16(pv), wp_ref[lo:lo + head_dim, :],
                            preferred_element_type=jnp.float32)
    o_ref[0] = xres + (acc + bp_ref[...])           # fused residual add


def _ln_mlp_kernel(x_ref, g_ref, b_ref, w1_ref, b1_ref, w2_ref, b2_ref, o_ref):
    # o = x + W2 @ GELU(W1 @ LN(x))   (whole MLP sublayer fused per row tile)
    x = x_ref[...]
    h = _ln_f32(x, g_ref[...], b_ref[...])
    h1 = jnp.dot(_bf16(h), w1_ref[...],
                 preferred_element_type=jnp.float32) + b1_ref[...]
    h1 = _gelu(h1)
    h2 = jnp.dot(_bf16(h1), w2_ref[...],
                 preferred_element_type=jnp.float32) + b2_ref[...]
    o_ref[...] = x + h2


def _ln_memory_kernel(x_ref, g_ref, b_ref, kt_ref, v_ref, o_ref, *, top_k):
    # o = x + MemoryLayer(LN(x));  keys pre-transposed (C, M), values (M, C).
    x = x_ref[...]                                  # (TM, C)
    h = _ln_f32(x, g_ref[...], b_ref[...])
    sim = jnp.dot(_bf16(h), kt_ref[...],
                  preferred_element_type=jnp.float32)        # (TM, M)
    TM, M = sim.shape
    lane = jax.lax.broadcasted_iota(jnp.int32, (TM, M), 1)

    masked = sim
    vals, ohs = [], []
    for _ in range(top_k):  # iterative top-k (lowest-index tie-break, matches lax.top_k)
        m = jnp.max(masked, axis=-1, keepdims=True)
        sel = jnp.min(jnp.where(masked == m, lane, M), axis=-1, keepdims=True)
        oh = lane == sel
        vals.append(m)
        ohs.append(oh)
        masked = jnp.where(oh, -jnp.inf, masked)

    gmax = vals[0]
    exps = [jnp.exp(v - gmax) for v in vals]
    denom = exps[0]
    for e in exps[1:]:
        denom = denom + e
    inv = 1.0 / denom                               # exact (see note above)

    w_full = jnp.zeros((TM, M), jnp.float32)
    for e, oh in zip(exps, ohs):
        w_full = w_full + jnp.where(oh, e * inv, 0.0)

    mem = jnp.dot(_bf16(w_full), v_ref[...], preferred_element_type=jnp.float32)
    o_ref[...] = x + mem


def _lnf_lmhead_kernel(x_ref, g_ref, b_ref, wt_ref, o_ref):
    # logits tile = LN_f(x_last) @ wte_t_block   (pre-transposed bf16 tied weight).
    # LN_f of the tiny (B, C) slab is recomputed per vocab tile; this keeps the
    # vocab grid axis "parallel" — the kernel is bound by the bf16 weight stream.
    h = _bf16(_ln_f32(x_ref[...], g_ref[...], b_ref[...]))
    o_ref[...] = jnp.dot(h, wt_ref[...], preferred_element_type=jnp.float32)


# ----------------------------------------------------------------------------
# Tile-size helpers (keep blocks VMEM-friendly and (8,128)-legal)
# ----------------------------------------------------------------------------
def _row_tile(n, target=256):
    # Multiple-of-8 divisor of n (<= target); never degrades below 8 — falls back
    # to a single full-extent block, which is always legal.
    if n <= target:
        return n
    t = (target // 8) * 8
    while t >= 8:
        if n % t == 0:
            return t
        t -= 8
    return n


def _col_tile(d, target=512):
    # Prefer multiples of 256 (v6e/v7x MXU), then 128; else full extent.
    if d <= target:
        return d
    for step in (256, 128):
        t = (target // step) * step
        while t >= step:
            if d % t == 0:
                return t
            t -= step
    return d


_VMEM_LIMIT = 64 * 1024 * 1024  # raise the default scoped-VMEM limit (v5e: 16 MiB)


# ----------------------------------------------------------------------------
# Pallas wrappers
# ----------------------------------------------------------------------------
def ln_matmul(x, g, b, w, bias, *, tm, tn, out_dtype=jnp.bfloat16):
    N, C = x.shape
    Dout = w.shape[1]
    return pl.pallas_call(
        _ln_matmul_kernel,
        grid=(N // tm, Dout // tn),
        in_specs=[
            pl.BlockSpec((tm, C), lambda i, j: (i, 0)),
            pl.BlockSpec((1, C), lambda i, j: (0, 0)),
            pl.BlockSpec((1, C), lambda i, j: (0, 0)),
            pl.BlockSpec((C, tn), lambda i, j: (0, j)),
            pl.BlockSpec((1, tn), lambda i, j: (0, j)),
        ],
        out_specs=pl.BlockSpec((tm, tn), lambda i, j: (i, j)),
        out_shape=jax.ShapeDtypeStruct((N, Dout), out_dtype),
        scratch_shapes=[pltpu.VMEM((tm, C), jnp.bfloat16)],   # cached bf16 LN(x)
        compiler_params=pltpu.CompilerParams(
            dimension_semantics=("parallel", "arbitrary"),
            vmem_limit_bytes=_VMEM_LIMIT),
    )(x, g, b, w, bias)


def attention_block(x_res, qkv, w_proj, b_proj, *, n_head, tq):
    B, T, C = x_res.shape
    hd = C // n_head
    kern = partial(_attn_kernel, n_head=n_head, head_dim=hd,
                   scale=1.0 / math.sqrt(hd))
    # Three BlockSpec views of the same (B, T, 3C) bf16 qkv array:
    #   Q  -> (1, tq, C) query-tile slice (column block 0)
    #   K  -> (1, T,  C) full sequence (column block 1), constant in the q axis
    #   V  -> (1, T,  C) full sequence (column block 2), constant in the q axis
    return pl.pallas_call(
        kern,
        grid=(B, T // tq),
        in_specs=[
            pl.BlockSpec((1, tq, C), lambda bi, qi: (bi, qi, 0)),
            pl.BlockSpec((1, tq, C), lambda bi, qi: (bi, qi, 0)),
            pl.BlockSpec((1, T, C), lambda bi, qi: (bi, 0, 1)),
            pl.BlockSpec((1, T, C), lambda bi, qi: (bi, 0, 2)),
            pl.BlockSpec((C, C), lambda bi, qi: (0, 0)),
            pl.BlockSpec((1, C), lambda bi, qi: (0, 0)),
        ],
        out_specs=pl.BlockSpec((1, tq, C), lambda bi, qi: (bi, qi, 0)),
        out_shape=jax.ShapeDtypeStruct((B, T, C), jnp.float32),
        compiler_params=pltpu.CompilerParams(
            dimension_semantics=("parallel", "parallel"),
            vmem_limit_bytes=_VMEM_LIMIT),
    )(x_res, qkv, qkv, qkv, w_proj, b_proj)


def ln_mlp(x, g, b, w1, b1, w2, b2, *, tm):
    N, C = x.shape
    Hd = w1.shape[1]
    return pl.pallas_call(
        _ln_mlp_kernel,
        grid=(N // tm,),
        in_specs=[
            pl.BlockSpec((tm, C), lambda i: (i, 0)),
            pl.BlockSpec((1, C), lambda i: (0, 0)),
            pl.BlockSpec((1, C), lambda i: (0, 0)),
            pl.BlockSpec((C, Hd), lambda i: (0, 0)),
            pl.BlockSpec((1, Hd), lambda i: (0, 0)),
            pl.BlockSpec((Hd, C), lambda i: (0, 0)),
            pl.BlockSpec((1, C), lambda i: (0, 0)),
        ],
        out_specs=pl.BlockSpec((tm, C), lambda i: (i, 0)),
        out_shape=jax.ShapeDtypeStruct((N, C), jnp.float32),
        compiler_params=pltpu.CompilerParams(
            dimension_semantics=("parallel",),
            vmem_limit_bytes=_VMEM_LIMIT),
    )(x, g, b, w1, b1, w2, b2)


def ln_memory(x, g, b, keys_t, values, *, top_k, tm):
    N, C = x.shape
    M = values.shape[0]
    assert top_k <= M, "top_k must not exceed memory_size"
    return pl.pallas_call(
        partial(_ln_memory_kernel, top_k=top_k),
        grid=(N // tm,),
        in_specs=[
            pl.BlockSpec((tm, C), lambda i: (i, 0)),
            pl.BlockSpec((1, C), lambda i: (0, 0)),
            pl.BlockSpec((1, C), lambda i: (0, 0)),
            pl.BlockSpec((C, M), lambda i: (0, 0)),
            pl.BlockSpec((M, C), lambda i: (0, 0)),
        ],
        out_specs=pl.BlockSpec((tm, C), lambda i: (i, 0)),
        out_shape=jax.ShapeDtypeStruct((N, C), jnp.float32),
        compiler_params=pltpu.CompilerParams(
            dimension_semantics=("parallel",),
            vmem_limit_bytes=_VMEM_LIMIT),
    )(x, g, b, keys_t, values)


def lnf_lm_head(x_last, g, b, wte_t, *, tv):
    Brows, C = x_last.shape
    Vp = wte_t.shape[1]
    return pl.pallas_call(
        _lnf_lmhead_kernel,
        grid=(Vp // tv,),
        in_specs=[
            pl.BlockSpec((Brows, C), lambda j: (0, 0)),
            pl.BlockSpec((1, C), lambda j: (0, 0)),
            pl.BlockSpec((1, C), lambda j: (0, 0)),
            pl.BlockSpec((C, tv), lambda j: (0, j)),
        ],
        out_specs=pl.BlockSpec((Brows, tv), lambda j: (0, j)),
        out_shape=jax.ShapeDtypeStruct((Brows, Vp), jnp.float32),
        compiler_params=pltpu.CompilerParams(dimension_semantics=("parallel",)),
    )(x_last, g, b, wte_t)


# ----------------------------------------------------------------------------
# Parameter init (deterministic, mirrors GPT.__init__ / _init_weights).
# Dense matmul weights are stored once in (in, out) layout and in bf16 (the MXU
# operand dtype); the tied lm_head weight gets a pre-transposed bf16 (C, V_pad)
# copy so the head streams half the bytes and needs no in-kernel transpose.
# ----------------------------------------------------------------------------
def init_params(key, cfg):
    C = cfg["n_embd"]
    V = cfg["vocab_size"]
    std = 0.02
    proj_std = 0.02 / math.sqrt(2 * cfg["n_layer"])
    keys = iter(jax.random.split(key, 8 * cfg["n_layer"] + 8))

    def dense(k, shape, s):
        return (jax.random.normal(k, shape, jnp.float32) * s).astype(jnp.bfloat16)

    wte = jax.random.normal(next(keys), (V, C), jnp.float32) * std
    V_pad = ((V + 127) // 128) * 128
    wte_t = wte.T.astype(jnp.bfloat16)
    if V_pad != V:
        wte_t = jnp.pad(wte_t, ((0, 0), (0, V_pad - V)))

    params = {
        "wte": wte,
        "wte_t": wte_t,                                   # (C, V_pad) bf16 for lm_head
        "wpe": jax.random.normal(next(keys), (cfg["block_size"], C), jnp.float32) * std,
        "lnf_w": jnp.ones((1, C), jnp.float32),
        "lnf_b": jnp.zeros((1, C), jnp.float32),
        "layers": [],
    }
    for i in range(cfg["n_layer"]):
        is_mem = (i + 1) in cfg["memory_layers"]
        lp = {
            "is_mem": is_mem,
            "ln1_w": jnp.ones((1, C), jnp.float32), "ln1_b": jnp.zeros((1, C), jnp.float32),
            "ln2_w": jnp.ones((1, C), jnp.float32), "ln2_b": jnp.zeros((1, C), jnp.float32),
            "attn_w": dense(next(keys), (C, 3 * C), std),            # (in, out)
            "attn_b": jnp.zeros((1, 3 * C), jnp.float32),
            "attn_proj_w": dense(next(keys), (C, C), proj_std),       # (in, out)
            "attn_proj_b": jnp.zeros((1, C), jnp.float32),
        }
        if is_mem:
            lp["mem_keys_t"] = jax.random.normal(                     # keys^T: (C, M)
                next(keys), (C, cfg["memory_size"]), jnp.float32).astype(jnp.bfloat16)
            lp["mem_values"] = jax.random.normal(                     # (M, C)
                next(keys), (cfg["memory_size"], C), jnp.float32).astype(jnp.bfloat16)
        else:
            lp["fc_w"] = dense(next(keys), (C, 4 * C), std)
            lp["fc_b"] = jnp.zeros((1, 4 * C), jnp.float32)
            lp["mlp_proj_w"] = dense(next(keys), (4 * C, C), proj_std)
            lp["mlp_proj_b"] = jnp.zeros((1, C), jnp.float32)
        params["layers"].append(lp)
    return params


# ----------------------------------------------------------------------------
# Forward pass (targets=None path: logits for the last position only)
# ----------------------------------------------------------------------------
def gpt_forward(idx, params, cfg):
    B, T = idx.shape
    C, H = cfg["n_embd"], cfg["n_head"]
    V = cfg["vocab_size"]
    N = B * T
    assert T % 8 == 0, "pad the sequence length to a multiple of 8"
    assert C % H == 0 and (C // H) % 8 == 0

    tok_emb = jnp.take(params["wte"], idx, axis=0)           # (B, T, C)
    x = (tok_emb + params["wpe"][:T]).reshape(N, C)          # dropout p=0 → identity

    tm = _row_tile(N)
    tq = _row_tile(T)
    for lp in params["layers"]:
        # ---- attention sublayer: fused LN1+QKV (bf16 out), then fused
        #      multi-head causal attn + out-proj + residual ----
        qkv = ln_matmul(x, lp["ln1_w"], lp["ln1_b"], lp["attn_w"], lp["attn_b"],
                        tm=tm, tn=_col_tile(3 * C), out_dtype=jnp.bfloat16)
        x = attention_block(x.reshape(B, T, C), qkv.reshape(B, T, 3 * C),
                            lp["attn_proj_w"], lp["attn_proj_b"],
                            n_head=H, tq=tq).reshape(N, C)
        # ---- second sublayer: fused LN2 + (MLP | MemoryLayer) + residual ----
        if lp["is_mem"]:
            x = ln_memory(x, lp["ln2_w"], lp["ln2_b"], lp["mem_keys_t"],
                          lp["mem_values"], top_k=cfg["top_k"], tm=tm)
        else:
            x = ln_mlp(x, lp["ln2_w"], lp["ln2_b"], lp["fc_w"], lp["fc_b"],
                       lp["mlp_proj_w"], lp["mlp_proj_b"], tm=tm)

    x_last = x.reshape(B, T, C)[:, -1, :]                    # (B, C)
    logits = lnf_lm_head(x_last, params["lnf_w"], params["lnf_b"], params["wte_t"],
                         tv=_col_tile(params["wte_t"].shape[1]))
    return logits[:, :V].reshape(B, 1, V)


# ----------------------------------------------------------------------------
# Pure-JAX reference for the numerical sanity check.  It mirrors the kernels'
# precision policy (bf16 MXU operands / bf16 qkv handoff, f32 accumulation) so
# the comparison isolates logic errors rather than expected bf16 quantization.
# ----------------------------------------------------------------------------
def _ref_ln(x, w, b):
    mu = x.mean(-1, keepdims=True)
    var = ((x - mu) ** 2).mean(-1, keepdims=True)
    return (x - mu) * jax.lax.rsqrt(var + 1e-5) * w + b


def ref_forward(idx, params, cfg):
    B, T = idx.shape
    C, H = cfg["n_embd"], cfg["n_head"]
    hd = C // H

    def mm(a, w):  # (.., K) x (K, D) with bf16 operands, f32 accumulation
        return jnp.matmul(a.astype(jnp.bfloat16), w.astype(jnp.bfloat16),
                          preferred_element_type=jnp.float32)

    x = params["wte"][idx] + params["wpe"][:T]
    for lp in params["layers"]:
        h = _ref_ln(x, lp["ln1_w"], lp["ln1_b"])
        qkv = (mm(h, lp["attn_w"]) + lp["attn_b"][0]).astype(jnp.bfloat16)  # bf16 handoff
        q, k, v = jnp.split(qkv, 3, axis=2)
        heads = lambda a: a.reshape(B, T, H, hd).transpose(0, 2, 1, 3)
        q, k, v = heads(q), heads(k), heads(v)
        att = jnp.einsum("bhqd,bhkd->bhqk", q, k,
                         preferred_element_type=jnp.float32) * (1.0 / math.sqrt(hd))
        att = jnp.where(jnp.tril(jnp.ones((T, T), bool)), att, -jnp.inf)
        att = jax.nn.softmax(att, axis=-1)
        y = jnp.einsum("bhqk,bhkd->bhqd", att.astype(jnp.bfloat16), v,
                       preferred_element_type=jnp.float32)
        y = y.transpose(0, 2, 1, 3).reshape(B, T, C)
        y = mm(y, lp["attn_proj_w"]) + lp["attn_proj_b"][0]
        x = x + y

        h2 = _ref_ln(x, lp["ln2_w"], lp["ln2_b"])
        if lp["is_mem"]:
            xf = h2.reshape(-1, C)
            sim = mm(xf, lp["mem_keys_t"])
            tv, ti = jax.lax.top_k(sim, cfg["top_k"])
            rv = lp["mem_values"].astype(jnp.float32)[ti]           # (N, k, C)
            w = jax.nn.softmax(tv, axis=-1).astype(jnp.bfloat16).astype(jnp.float32)
            out = jnp.sum(w[..., None] * rv, axis=1).reshape(B, T, C)
        else:
            hm = mm(h2, lp["fc_w"]) + lp["fc_b"][0]
            hm = jax.nn.gelu(hm, approximate=False)
            out = mm(hm, lp["mlp_proj_w"]) + lp["mlp_proj_b"][0]
        x = x + out

    x = _ref_ln(x, params["lnf_w"], params["lnf_b"])
    logits = jax.lax.dot_general(x[:, -1, :].astype(jnp.bfloat16),
                                 params["wte"].astype(jnp.bfloat16),
                                 (((1,), (1,)), ((), ())),
                                 preferred_element_type=jnp.float32)
    return logits[:, None, :]


# ----------------------------------------------------------------------------
if __name__ == "__main__":
    cfg = dict(
        vocab_size=256, block_size=64, n_layer=2, n_head=4, n_embd=128,
        dropout=0.0, bias=True,
        memory_size=256, top_k=8, memory_layers=(2,),   # layer 2 -> BlockWithMemory
    )
    key = jax.random.PRNGKey(0)
    pkey, ikey = jax.random.split(key)
    params = init_params(pkey, cfg)

    B, T = 2, 64
    idx = jax.random.randint(ikey, (B, T), 0, cfg["vocab_size"], dtype=jnp.int32)

    logits = jax.block_until_ready(gpt_forward(idx, params, cfg))
    ref = jax.block_until_ready(ref_forward(idx, params, cfg))

    err = float(np.max(np.abs(np.asarray(logits) - np.asarray(ref))))
    assert logits.shape == (B, 1, cfg["vocab_size"])
    # Tolerance note: the memory layer's unscaled similarity logits (|sim| ~ sqrt(C))
    # exponentially amplify benign last-bit differences between the Pallas/MXU path
    # and the XLA reference path, so a small absolute slack is kept on top of the
    # bf16-level relative tolerance.
    assert np.allclose(np.asarray(logits), np.asarray(ref), rtol=2e-2, atol=1e-2), \
        f"mismatch vs reference, max abs err={err}"
    print("KERNEL_OK")
</pallas_src>

<mosaic_0001>
module attributes {stable_mosaic.version = 11 : i64} {
  func.func @_ln_matmul_kernel(%arg0: i32, %arg1: i32, %arg2: memref<128x128xf32, #tpu.memory_space<vmem>>, %arg3: memref<1x128xf32, #tpu.memory_space<vmem>>, %arg4: memref<1x128xf32, #tpu.memory_space<vmem>>, %arg5: memref<128x384xbf16, #tpu.memory_space<vmem>>, %arg6: memref<1x384xf32, #tpu.memory_space<vmem>>, %arg7: memref<128x384xbf16, #tpu.memory_space<vmem>>, %arg8: memref<128x128xbf16, #tpu.memory_space<vmem>>) attributes {dimension_semantics = [#tpu.dimension_semantics<parallel>, #tpu.dimension_semantics<arbitrary>], iteration_bounds = array<i64: 1, 1>, scalar_prefetch = 0 : i64, scratch_operands = 1 : i64, tpu.core_type = #tpu.core_type<tc>, window_params = [{transform_indices = @transform_0, window_bounds = array<i64: 128, 128>}, {pipeline_mode = #tpu.pipeline_mode<synchronous>, transform_indices = @transform_1, window_bounds = array<i64: 1, 128>}, {pipeline_mode = #tpu.pipeline_mode<synchronous>, transform_indices = @transform_2, window_bounds = array<i64: 1, 128>}, {transform_indices = @transform_3, window_bounds = array<i64: 128, 384>}, {transform_indices = @transform_4, window_bounds = array<i64: 1, 384>}, {transform_indices = @transform_5, window_bounds = array<i64: 128, 384>}]} {
    %c0_i32 = arith.constant 0 : i32
    %0 = arith.cmpi eq, %arg1, %c0_i32 : i32
    %1 = arith.extui %0 : i1 to i32
    %c0_i32_0 = arith.constant 0 : i32
    %2 = arith.cmpi ne, %1, %c0_i32_0 : i32
    scf.if %2 {
      %c0_8 = arith.constant 0 : index
      %c0_9 = arith.constant 0 : index
      %11 = vector.load %arg2[%c0_8, %c0_9] : memref<128x128xf32, #tpu.memory_space<vmem>>, vector<128x128xf32>
      %c0_10 = arith.constant 0 : index
      %c0_11 = arith.constant 0 : index
      %12 = vector.load %arg3[%c0_10, %c0_11] : memref<1x128xf32, #tpu.memory_space<vmem>>, vector<1x128xf32>
      %c0_12 = arith.constant 0 : index
      %c0_13 = arith.constant 0 : index
      %13 = vector.load %arg4[%c0_12, %c0_13] : memref<1x128xf32, #tpu.memory_space<vmem>>, vector<1x128xf32>
      %cst_14 = arith.constant dense<0.000000e+00> : vector<128xf32>
      %14 = vector.multi_reduction <add>, %11, %cst_14 [1] : vector<128x128xf32> to vector<128xf32>
      %15 = vector.shape_cast %14 : vector<128xf32> to vector<128x1xf32>
      %cst_15 = arith.constant 1.280000e+02 : f32
      %16 = vector.broadcast %cst_15 : f32 to vector<128x1xf32>
      %17 = arith.divf %15, %16 : vector<128x1xf32>
      %18 = vector.broadcast %17 : vector<128x1xf32> to vector<128x128xf32>
      %19 = arith.subf %11, %18 : vector<128x128xf32>
      %20 = arith.mulf %19, %19 : vector<128x128xf32>
      %cst_16 = arith.constant dense<0.000000e+00> : vector<128xf32>
      %21 = vector.multi_reduction <add>, %20, %cst_16 [1] : vector<128x128xf32> to vector<128xf32>
      %22 = vector.shape_cast %21 : vector<128xf32> to vector<128x1xf32>
      %cst_17 = arith.constant 1.280000e+02 : f32
      %23 = vector.broadcast %cst_17 : f32 to vector<128x1xf32>
      %24 = arith.divf %22, %23 : vector<128x1xf32>
      %cst_18 = arith.constant 9.99999974E-6 : f32
      %25 = vector.broadcast %cst_18 : f32 to vector<128x1xf32>
      %26 = arith.addf %24, %25 : vector<128x1xf32>
      %27 = math.rsqrt %26 : vector<128x1xf32>
      %28 = vector.broadcast %27 : vector<128x1xf32> to vector<128x128xf32>
      %29 = arith.mulf %19, %28 : vector<128x128xf32>
      %30 = vector.broadcast %12 : vector<1x128xf32> to vector<128x128xf32>
      %31 = arith.mulf %29, %30 : vector<128x128xf32>
      %32 = vector.broadcast %13 : vector<1x128xf32> to vector<128x128xf32>
      %33 = arith.addf %31, %32 : vector<128x128xf32>
      %34 = arith.truncf %33 : vector<128x128xf32> to vector<128x128xbf16>
      %c0_19 = arith.constant 0 : index
      %c0_20 = arith.constant 0 : index
      %35 = vector.load %arg8[%c0_19, %c0_20] : memref<128x128xbf16, #tpu.memory_space<vmem>>, vector<128x128xbf16>
      tpu.vector_store %arg8[%c0_19, %c0_20], %34 {strides = array<i32>} : memref<128x128xbf16, #tpu.memory_space<vmem>>, vector<128x128xbf16>,
    } else {
    }
    %c0 = arith.constant 0 : index
    %c0_1 = arith.constant 0 : index
    %3 = vector.load %arg8[%c0, %c0_1] : memref<128x128xbf16, #tpu.memory_space<vmem>>, vector<128x128xbf16>
    %c0_2 = arith.constant 0 : index
    %c0_3 = arith.constant 0 : index
    %4 = vector.load %arg5[%c0_2, %c0_3] : memref<128x384xbf16, #tpu.memory_space<vmem>>, vector<128x384xbf16>
    %cst = arith.constant dense<0.000000e+00> : vector<128x384xf32>
    %5 = tpu.matmul %3, %4, %cst {dimension_numbers = #tpu.dot_dimension_numbers<[1], [0], [0], [1], [0, 0, 1, 1], [], []>} : vector<128x128xbf16>, vector<128x384xbf16>, vector<128x384xf32> -> vector<128x384xf32>
    %c0_4 = arith.constant 0 : index
    %c0_5 = arith.constant 0 : index
    %6 = vector.load %arg6[%c0_4, %c0_5] : memref<1x384xf32, #tpu.memory_space<vmem>>, vector<1x384xf32>
    %7 = vector.broadcast %6 : vector<1x384xf32> to vector<128x384xf32>
    %8 = arith.addf %5, %7 : vector<128x384xf32>
    %9 = arith.truncf %8 : vector<128x384xf32> to vector<128x384xbf16>
    %c0_6 = arith.constant 0 : index
    %c0_7 = arith.constant 0 : index
    %10 = vector.load %arg7[%c0_6, %c0_7] : memref<128x384xbf16, #tpu.memory_space<vmem>>, vector<128x384xbf16>
    tpu.vector_store %arg7[%c0_6, %c0_7], %9 {strides = array<i32>} : memref<128x384xbf16, #tpu.memory_space<vmem>>, vector<128x384xbf16>,
    return
  }
  func.func @transform_0(%arg0: i32, %arg1: i32) -> (i32, i32) {
    %c0_i32 = arith.constant 0 : i32
    %c0_i32_0 = arith.constant 0 : i32
    return %arg0, %c0_i32 : i32, i32
  }
  func.func @transform_1(%arg0: i32, %arg1: i32) -> (i32, i32) {
    %c0_i32 = arith.constant 0 : i32
    %c0_i32_0 = arith.constant 0 : i32
    %c0_i32_1 = arith.constant 0 : i32
    return %c0_i32, %c0_i32_0 : i32, i32
  }
  func.func @transform_2(%arg0: i32, %arg1: i32) -> (i32, i32) {
    %c0_i32 = arith.constant 0 : i32
    %c0_i32_0 = arith.constant 0 : i32
    %c0_i32_1 = arith.constant 0 : i32
    return %c0_i32, %c0_i32_0 : i32, i32
  }
  func.func @transform_3(%arg0: i32, %arg1: i32) -> (i32, i32) {
    %c0_i32 = arith.constant 0 : i32
    %c0_i32_0 = arith.constant 0 : i32
    return %c0_i32, %arg1 : i32, i32
  }
  func.func @transform_4(%arg0: i32, %arg1: i32) -> (i32, i32) {
    %c0_i32 = arith.constant 0 : i32
    %c0_i32_0 = arith.constant 0 : i32
    return %c0_i32, %arg1 : i32, i32
  }
  func.func @transform_5(%arg0: i32, %arg1: i32) -> (i32, i32) {
    %c0_i32 = arith.constant 0 : i32
    return %arg0, %arg1 : i32, i32
  }
}

</mosaic_0001>

<bundles_post_ra>
// kernel: tpu_custom_call.1
= control target key start
LH: loop header
LB: loop body
LE: loop exit
PB: predicated region body
PF: predicated region fallthrough
CT: control target
= control target key end

     0   :  { %10 = vsyncpa [#allocation4], 0  ;;  %s1665_s0 = inlined_call_operand.hbm [shape: f32[128,128], index: 0, kind: input, shape index: {}]   ;;  %s1666_s1 = inlined_call_operand.vmem [shape: f32[1,128], index: 1, kind: input, shape index: {}]   ;;  %s1667_s2 = inlined_call_operand.vmem [shape: f32[1,128], index: 2, kind: input, shape index: {}]   ;;  %s1668_s3 = inlined_call_operand.hbm [shape: bf16[128,384], index: 3, kind: input, shape index: {}]   ;;  %s1669_s4 = inlined_call_operand.vmem [shape: f32[1,384], index: 4, kind: input, shape index: {}]   ;;  %s1670_s5 = inlined_call_operand.hbm [shape: bf16[128,384], index: 5, kind: output, shape index: {}]  }
   0x1   :  { %11 = vsyncpa [#allocation7], 0 }
   0x2   :  { %12 = vsyncpa [#allocation5], 0  ;;  %s1405_s18 = smov [#allocation3]  }
   0x3   :  { %s18_s19 = sshll.u32 %s1405_s18, 4  ;;  %s19_s19 = int_to_ptr.vmem [resolvable:$true] %s18_s19 }
   0x4   :  { %s1347_s20 = scalar_lea.vmem %s19_s19, 2048  ;;  %p1352_p1 = scmp.lt.s32.totalorder %s19_s19, %s19_s19 }
   0x5   :  { %p1348_p0 = scmp.ne.s32.totalorder %s19_s19, %s1347_s20  ;;  %p1353_p2 = scmp.lt.s32.totalorder %s1347_s20, %s1347_s20 }
   0x7   :  { %p1354_p3 = por %p1353_p2, %p1352_p1 }
   0x9   :  { %p1355_p4 = pnand %p1354_p3, %p1348_p0 }
   0xb   :  { %1358 = shalt.err (!%p1355_p4)
}
   0xc   :  { %s1406_s21 = smov 128   ;;  %s1407_s22 = smov 8  }
   0xd   :  { %24 = dma.hbm_to_vmem [thread:$0]  %s1665_s0, 2048, %s19_s19, [#allocation4], %s1406_s21, %s1406_s21, %s1407_s22  }
   0xe   :  { %s1408_s25 = smov [#allocation6]  }
   0xf   :  { %s34_s26 = sshll.u32 %s1408_s25, 4  ;;  %s35_s26 = int_to_ptr.vmem [resolvable:$true] %s34_s26 }
  0x10   :  { %s1367_s27 = scalar_lea.vmem %s35_s26, 3072  ;;  %p1372_p6 = scmp.lt.s32.totalorder %s35_s26, %s35_s26 }
  0x11   :  { %p1368_p5 = scmp.ne.s32.totalorder %s35_s26, %s1367_s27  ;;  %p1373_p7 = scmp.lt.s32.totalorder %s1367_s27, %s1367_s27 }
  0x13   :  { %p1374_p8 = por %p1373_p7, %p1372_p6 }
  0x15   :  { %p1375_p9 = pnand %p1374_p8, %p1368_p5 }
  0x17   :  { %1378 = shalt.err (!%p1375_p9)
}
  0x18   :  { %s1409_s28 = smov 192   ;;  %s1410_s29 = smov 12  }
  0x19   :  { %40 = dma.hbm_to_vmem [thread:$0]  %s1668_s3, 3072, %s35_s26, [#allocation7], %s1409_s28, %s1409_s28, %s1410_s29  }
  0x1a   :  { %1399 = dma.done.wait [#allocation4], 2048  }
  0x1b   :  { %1400 = vsyncadd [#allocation4], 4294965248 }
  0x1c   :  { %1401 = dma.done.wait [#allocation7], 3072  }
  0x1d   :  { %1402 = vsyncadd [#allocation7], 4294964224  ;;  %v54_v0 = vld [vmem:[#allocation3] sm:$0xff]  ;;  %v56_v1 = vld [vmem:[#allocation3 + $0x10] sm:$0xff] }
  0x1e   :  { %72 = vadd.xlane.f32.xlu0 %v54_v0  ;;  %76 = vadd.xlane.f32.xlu1 %v56_v1  ;;  %v55_v2 = vld [vmem:[#allocation3 + $0x8] sm:$0xff]  ;;  %v57_v3 = vld [vmem:[#allocation3 + $0x18] sm:$0xff]  ;;  %v58_v4 = vld [vmem:[#allocation3 + $0x20] sm:$0xff] }
  0x1f   :  { %v59_v5 = vld [vmem:[#allocation3 + $0x28] sm:$0xff]  ;;  %v60_v6 = vld [vmem:[#allocation3 + $0x30] sm:$0xff]  ;;  %v61_v7 = vld [vmem:[#allocation3 + $0x38] sm:$0xff] }
  0x20   :  { %v62_v8 = vld [vmem:[#allocation3 + $0x40] sm:$0xff]  ;;  %v63_v9 = vld [vmem:[#allocation3 + $0x48] sm:$0xff]  ;;  %v64_v10 = vld [vmem:[#allocation3 + $0x50] sm:$0xff] }
  0x21   :  { %v1452_v11 = vld [vmem:[#allocation3 + $0x58] sm:$0xff]  ;;  %v1455_v12 = vld [vmem:[#allocation3 + $0x60] sm:$0xff]  ;;  %v1457_v13 = vld [vmem:[#allocation3 + $0x68] sm:$0xff] }
  0x22   :  { %74 = vadd.xlane.f32.xlu0 %v55_v2  ;;  %78 = vadd.xlane.f32.xlu1 %v57_v3  ;;  %v1461_v14 = vld [vmem:[#allocation3 + $0x70] sm:$0xff]  ;;  %v1463_v15 = vld [vmem:[#allocation3 + $0x78] sm:$0xff] }
  0x23   :  { %v1267_v62 = vld [vmem:[#allocation6 + $0xac] ss:$12 sps:$4 sm:$0xff]  }
  0x24   :  { %614 = vmatprep.subr.bf16.mxu0 %v1267_v62 }
  0x26   :  { %80 = vadd.xlane.f32.xlu0 %v58_v4  ;;  %82 = vadd.xlane.f32.xlu1 %v59_v5 }
  0x2a   :  { %84 = vadd.xlane.f32.xlu0 %v60_v6  ;;  %86 = vadd.xlane.f32.xlu1 %v61_v7 }
  0x2e   :  { %88 = vadd.xlane.f32.xlu0 %v62_v8  ;;  %90 = vadd.xlane.f32.xlu1 %v63_v9 }
  0x32   :  { %92 = vadd.xlane.f32.xlu0 %v64_v10  ;;  %94 = vadd.xlane.f32.xlu1 %v1452_v11 }
  0x36   :  { %96 = vadd.xlane.f32.xlu0 %v1455_v12  ;;  %98 = vadd.xlane.f32.xlu1 %v1457_v13 }
  0x3a   :  { %100 = vadd.xlane.f32.xlu0 %v1461_v14  ;;  %102 = vadd.xlane.f32.xlu1 %v1463_v15 }
  0xa7   :  { %v73_v16 = vpop.xlane.xlu0 %72  ;;  %v77_v17 = vpop.xlane.xlu1 %76 }
  0xa8   :  { %v105_v18 = vmul.f32 0.0078125, %v73_v16  ;;  %v107_v19 = vmul.f32 0.0078125, %v77_v17  ;;  %v1273_v16 = vld [vmem:[#allocation6 + $0x90] ss:$12 sps:$4 sm:$0xff]  }
  0xaa   :  { %v1467_v20 = vsub.f32 %v54_v0, %v105_v18  ;;  %v1469_v21 = vsub.f32 %v56_v1, %v107_v19  ;;  %v1269_v1 = vld [vmem:[#allocation6 + $0xa8] ss:$12 sps:$4 sm:$0xff]  }
  0xab   :  { %v75_v22 = vpop.xlane.xlu0 %74  ;;  %v79_v23 = vpop.xlane.xlu1 %78  ;;  %615 = vmatpush1.bf16.msra.mxu0 %v1269_v1 }
  0xac   :  { %v106_v24 = vmul.f32 0.0078125, %v75_v22  ;;  %v137_v25 = vmul.f32 %v1467_v20, %v1467_v20  ;;  %v108_v26 = vmul.f32 0.0078125, %v79_v23  ;;  %v139_v29 = vmul.f32 %v1469_v21, %v1469_v21  ;;  %v1274_v23 = vld [vmem:[#allocation6 + $0x7c] ss:$12 sps:$4 sm:$0xff]  }
  0xae   :  { %v1473_v27 = vsub.f32 %v55_v2, %v106_v24  ;;  %153 = vadd.xlane.f32.xlu0 %v137_v25  ;;  %v1475_v28 = vsub.f32 %v57_v3, %v108_v26  ;;  %v1276_v24 = vld [vmem:[#allocation6 + $0x98] ss:$12 sps:$4 sm:$0xff]  }
  0xaf   :  { %v81_v30 = vpop.xlane.xlu0 %80  ;;  %v83_v31 = vpop.xlane.xlu1 %82  ;;  %v1277_v25 = vld [vmem:[#allocation6 + $0x78] ss:$12 sps:$4 sm:$0xff]  }
  0xb0   :  { %v109_v32 = vmul.f32 0.0078125, %v81_v30  ;;  %v138_v33 = vmul.f32 %v1473_v27, %v1473_v27  ;;  %v110_v34 = vmul.f32 0.0078125, %v83_v31  ;;  %v140_v37 = vmul.f32 %v1475_v28, %v1475_v28  ;;  %v1281_v30 = vld [vmem:[#allocation6 + $0x60] ss:$12 sps:$4 sm:$0xff]  }
  0xb1   :  { %v1282_v31 = vld [vmem:[#allocation6 + $0x4c] ss:$12 sps:$4 sm:$0xff]  }
  0xb2   :  { %v1481_v35 = vsub.f32 %v58_v4, %v109_v32  ;;  %157 = vadd.xlane.f32.xlu0 %v139_v29  ;;  %155 = vadd.xlane.f32.xlu1 %v138_v33  ;;  %v1483_v36 = vsub.f32 %v59_v5, %v110_v34  ;;  %v1280_v29 = vld [vmem:[#allocation6 + $0x80] ss:$12 sps:$4 sm:$0xff]   ;;  %v1284_v32 = vld [vmem:[#allocation6 + $0x68] ss:$12 sps:$4 sm:$0xff]  }
  0xb3   :  { %v85_v38 = vpop.xlane.xlu0 %84  ;;  %v87_v39 = vpop.xlane.xlu1 %86  ;;  %v1285_v33 = vld [vmem:[#allocation6 + $0x48] ss:$12 sps:$4 sm:$0xff]  }
  0xb4   :  { %v111_v40 = vmul.f32 0.0078125, %v85_v38  ;;  %v141_v41 = vmul.f32 %v1481_v35, %v1481_v35  ;;  %v112_v42 = vmul.f32 0.0078125, %v87_v39  ;;  %v142_v45 = vmul.f32 %v1483_v36, %v1483_v36  ;;  %v1286_v34 = vld [vmem:[#allocation6 + $0x34] ss:$12 sps:$4 sm:$0xff]   ;;  %v1289_v38 = vld [vmem:[#allocation6 + $0x30] ss:$12 sps:$4 sm:$0xff]  }
  0xb5   :  { %v1290_v39 = vld [vmem:[#allocation6 + $0x1c] ss:$12 sps:$4 sm:$0xff]  }
  0xb6   :  { %v1489_v43 = vsub.f32 %v60_v6, %v111_v40  ;;  %159 = vadd.xlane.f32.xlu1 %v140_v37  ;;  %161 = vadd.xlane.f32.xlu0 %v141_v41  ;;  %v1491_v44 = vsub.f32 %v61_v7, %v112_v42  ;;  %v1288_v37 = vld [vmem:[#allocation6 + $0x50] ss:$12 sps:$4 sm:$0xff]   ;;  %v1292_v40 = vld [vmem:[#allocation6 + $0x38] ss:$12 sps:$4 sm:$0xff]  }
  0xb7   :  { %v89_v46 = vpop.xlane.xlu0 %88  ;;  %v91_v47 = vpop.xlane.xlu1 %90  ;;  %v1293_v41 = vld [vmem:[#allocation6 + $0x18] ss:$12 sps:$4 sm:$0xff]  }
  0xb8   :  { %v113_v48 = vmul.f32 0.0078125, %v89_v46  ;;  %v143_v49 = vmul.f32 %v1489_v43, %v1489_v43  ;;  %v114_v50 = vmul.f32 0.0078125, %v91_v47  ;;  %v144_v53 = vmul.f32 %v1491_v44, %v1491_v44  ;;  %v1294_v42 = vld [vmem:[#allocation6 + $0x4] ss:$12 sps:$4 sm:$0xff]   ;;  %v1297_v46 = vld [vmem:[#allocation6] ss:$12 sps:$4 sm:$0xff]  }
  0xb9   :  { %v1299_v47 = vld [vmem:[#allocation6 + $0x8] ss:$12 sps:$4 sm:$0xff]  }
  0xba   :  { %v1497_v51 = vsub.f32 %v62_v8, %v113_v48  ;;  %163 = vadd.xlane.f32.xlu1 %v142_v45  ;;  %165 = vadd.xlane.f32.xlu0 %v143_v49  ;;  %v1499_v52 = vsub.f32 %v63_v9, %v114_v50  ;;  %v1270_v8 = vld [vmem:[#allocation6 + $0x94] ss:$12 sps:$4 sm:$0xff]   ;;  %v1272_v9 = vld [vmem:[#allocation6 + $0xb0] ss:$12 sps:$4 sm:$0xff]   ;;  %v1411_v48 = vmov 0  }
  0xbb   :  { %v93_v54 = vpop.xlane.xlu0 %92  ;;  %v95_v55 = vpop.xlane.xlu1 %94  ;;  %616 = vmatprep.subr.bf16.mxu0 %v1270_v8  ;;  %1227 = vmatprep.subr.bf16.mxu1 %v1272_v9  ;;  %v1296_v45 = vld [vmem:[#allocation6 + $0x20] ss:$12 sps:$4 sm:$0xff]  }
  0xbc   :  { %v115_v56 = vmul.f32 0.0078125, %v93_v54  ;;  %v145_v57 = vmul.f32 %v1497_v51, %v1497_v51  ;;  %v116_v58 = vmul.f32 0.0078125, %v95_v55  ;;  %v146_v61 = vmul.f32 %v1499_v52, %v1499_v52  ;;  %617 = vmatpush1.bf16.msra.mxu0 %v1273_v16  ;;  %1228 = vmatpush3.bf16.msra.mxu1 %v1272_v9 }
  0xbd   :  { %618 = vmatprep.subr.bf16.mxu0 %v1274_v23  ;;  %1229 = vmatprep.subr.bf16.mxu1 %v1276_v24  ;;  %v1540_v23 = vld [vmem:[%s1666_s1] ss:$0 sm:$0xff] }
  0xbe   :  { %v1505_v59 = vsub.f32 %v64_v10, %v115_v56  ;;  %167 = vadd.xlane.f32.xlu1 %v144_v53  ;;  %169 = vadd.xlane.f32.xlu0 %v145_v57  ;;  %v1508_v60 = vsub.f32 %v1452_v11, %v116_v58 }
  0xbf   :  { %v97_v63 = vpop.xlane.xlu0 %96  ;;  %v99_v0 = vpop.xlane.xlu1 %98  ;;  %646 = vmatprep.mubr.bf16.mxu0 %v1411_v48 }
  0xc0   :  { %v117_v2 = vmul.f32 0.0078125, %v97_v63  ;;  %v147_v3 = vmul.f32 %v1505_v59, %v1505_v59  ;;  %v118_v4 = vmul.f32 0.0078125, %v99_v0  ;;  %v148_v7 = vmul.f32 %v1508_v60, %v1508_v60  ;;  %619 = vmatpush1.bf16.msra.mxu0 %v1277_v25  ;;  %1230 = vmatpush3.bf16.msra.mxu1 %v1276_v24 }
  0xc1   :  { %1231 = vmatprep.subr.bf16.mxu1 %v1280_v29 }
  0xc2   :  { %v1515_v5 = vsub.f32 %v1455_v12, %v117_v2  ;;  %171 = vadd.xlane.f32.xlu1 %v146_v61  ;;  %173 = vadd.xlane.f32.xlu0 %v147_v3  ;;  %v1518_v6 = vsub.f32 %v1457_v13, %v118_v4 }
  0xc3   :  { %v101_v10 = vpop.xlane.xlu0 %100  ;;  %v103_v11 = vpop.xlane.xlu1 %102 }
  0xc4   :  { %v119_v17 = vmul.f32 0.0078125, %v101_v10  ;;  %v149_v18 = vmul.f32 %v1515_v5, %v1515_v5  ;;  %v120_v19 = vmul.f32 0.0078125, %v103_v11  ;;  %v150_v22 = vmul.f32 %v1518_v6, %v1518_v6  ;;  %1232 = vmatpush3.bf16.msra.mxu1 %v1280_v29 }
  0xc5   :  { %1233 = vmatprep.subr.bf16.mxu1 %v1284_v32 }
  0xc6   :  { %v1525_v12 = vsub.f32 %v1461_v14, %v119_v17  ;;  %175 = vadd.xlane.f32.xlu1 %v148_v7  ;;  %177 = vadd.xlane.f32.xlu0 %v149_v18  ;;  %v1528_v13 = vsub.f32 %v1463_v15, %v120_v19  ;;  %v1278_v15 = vld [vmem:[#allocation6 + $0x64] ss:$12 sps:$4 sm:$0xff]  }
  0xc7   :  { %620 = vmatprep.subr.bf16.mxu0 %v1278_v15 }
  0xc8   :  { %v151_v26 = vmul.f32 %v1525_v12, %v1525_v12  ;;  %v152_v14 = vmul.f32 %v1528_v13, %v1528_v13  ;;  %621 = vmatpush1.bf16.msra.mxu0 %v1281_v30  ;;  %1234 = vmatpush3.bf16.msra.mxu1 %v1284_v32 }
  0xc9   :  { %622 = vmatprep.subr.bf16.mxu0 %v1282_v31  ;;  %1235 = vmatprep.subr.bf16.mxu1 %v1288_v37 }
  0xca   :  { %179 = vadd.xlane.f32.xlu1 %v150_v22  ;;  %181 = vadd.xlane.f32.xlu0 %v151_v26 }
  0xcc   :  { %623 = vmatpush1.bf16.msra.mxu0 %v1285_v33  ;;  %1236 = vmatpush3.bf16.msra.mxu1 %v1288_v37 }
  0xcd   :  { %624 = vmatprep.subr.bf16.mxu0 %v1286_v34  ;;  %1237 = vmatprep.subr.bf16.mxu1 %v1292_v40  ;;  %v1547_v34 = vld [vmem:[%s1667_s2] ss:$0 sm:$0xff] }
  0xce   :  { %183 = vadd.xlane.f32.xlu1 %v152_v14 }
  0xd0   :  { %625 = vmatpush1.bf16.msra.mxu0 %v1289_v38  ;;  %1238 = vmatpush3.bf16.msra.mxu1 %v1292_v40 }
  0xd1   :  { %626 = vmatprep.subr.bf16.mxu0 %v1290_v39  ;;  %1239 = vmatprep.subr.bf16.mxu1 %v1296_v45 }
  0xd4   :  { %627 = vmatpush1.bf16.msra.mxu0 %v1293_v41  ;;  %1240 = vmatpush3.bf16.msra.mxu1 %v1296_v45 }
  0xd5   :  { %628 = vmatprep.subr.bf16.mxu0 %v1294_v42  ;;  %1241 = vmatprep.subr.bf16.mxu1 %v1299_v47 }
  0xd8   :  { %629 = vmatpush1.bf16.msra.mxu0 %v1297_v46  ;;  %1242 = vmatpush3.bf16.msra.mxu1 %v1299_v47 }
 0x137   :  { %v154_v49 = vpop.xlane.xlu0 %153 }
 0x138   :  { %v185_v50 = vmul.f32 0.0078125, %v154_v49 }
 0x13a   :  { %v201_v53 = vadd.f32 1e-05, %v185_v50 }
 0x13b   :  { %v156_v54 = vpop.xlane.xlu1 %155  ;;  %v158_v55 = vpop.xlane.xlu0 %157 }
 0x13c   :  { %1307 = vrsqrt.f32 %v201_v53  ;;  %v186_v56 = vmul.f32 0.0078125, %v156_v54  ;;  %v187_v57 = vmul.f32 0.0078125, %v158_v55 }
 0x13e   :  { %v202_v58 = vadd.f32 1e-05, %v186_v56  ;;  %v203_v61 = vadd.f32 1e-05, %v187_v57 }
 0x13f   :  { %v160_v62 = vpop.xlane.xlu1 %159  ;;  %v162_v63 = vpop.xlane.xlu0 %161 }
 0x140   :  { %1309 = vrsqrt.f32 %v202_v58  ;;  %v188_v0 = vmul.f32 0.0078125, %v160_v62  ;;  %v189_v1 = vmul.f32 0.0078125, %v162_v63 }
 0x141   :  { %1311 = vrsqrt.f32 %v203_v61 }
 0x142   :  { %v204_v2 = vadd.f32 1e-05, %v188_v0  ;;  %v205_v3 = vadd.f32 1e-05, %v189_v1 }
 0x143   :  { %v164_v4 = vpop.xlane.xlu1 %163  ;;  %v166_v7 = vpop.xlane.xlu0 %165 }
 0x144   :  { %1313 = vrsqrt.f32 %v204_v2  ;;  %v190_v8 = vmul.f32 0.0078125, %v164_v4  ;;  %v191_v9 = vmul.f32 0.0078125, %v166_v7 }
 0x145   :  { %1315 = vrsqrt.f32 %v205_v3 }
 0x146   :  { %v206_v10 = vadd.f32 1e-05, %v190_v8  ;;  %v207_v11 = vadd.f32 1e-05, %v191_v9 }
 0x147   :  { %v168_v16 = vpop.xlane.xlu1 %167  ;;  %v170_v17 = vpop.xlane.xlu0 %169 }
 0x148   :  { %1317 = vrsqrt.f32 %v206_v10  ;;  %v192_v18 = vmul.f32 0.0078125, %v168_v16  ;;  %v193_v19 = vmul.f32 0.0078125, %v170_v17 }
 0x149   :  { %v1308_v22 = vpop.eup %1307  ;;  %1319 = vrsqrt.f32 %v207_v11 }
 0x14a   :  { %v233_v24 = vmul.f32 %v1308_v22, %v1467_v20  ;;  %v208_v25 = vadd.f32 1e-05, %v192_v18  ;;  %v209_v26 = vadd.f32 1e-05, %v193_v19 }
 0x14b   :  { %v172_v14 = vpop.xlane.xlu1 %171  ;;  %v174_v15 = vpop.xlane.xlu0 %173 }
 0x14c   :  { %1321 = vrsqrt.f32 %v208_v25  ;;  %v194_v29 = vmul.f32 0.0078125, %v172_v14  ;;  %v195_v30 = vmul.f32 0.0078125, %v174_v15  ;;  %v255_v32 = vmul.f32 %v1540_v23, %v233_v24 }
 0x14d   :  { %v1310_v31 = vpop.eup %1309  ;;  %1323 = vrsqrt.f32 %v209_v26 }
 0x14e   :  { %v1312_v33 = vpop.eup %1311  ;;  %v234_v37 = vmul.f32 %v1310_v31, %v1473_v27  ;;  %v210_v20 = vadd.f32 1e-05, %v194_v29  ;;  %v211_v38 = vadd.f32 1e-05, %v195_v30  ;;  %v277_v49 = vadd.f32 %v1547_v34, %v255_v32 }
 0x14f   :  { %v235_v39 = vmul.f32 %v1312_v33, %v1469_v21  ;;  %v176_v40 = vpop.xlane.xlu1 %175  ;;  %v178_v41 = vpop.xlane.xlu0 %177 }
 0x150   :  { %v256_v42 = vmul.f32 %v1540_v23, %v234_v37  ;;  %1325 = vrsqrt.f32 %v210_v20  ;;  %v196_v45 = vmul.f32 0.0078125, %v176_v40  ;;  %v197_v46 = vmul.f32 0.0078125, %v178_v41 }
 0x151   :  { %v1314_v47 = vpop.eup %1313  ;;  %v257_v50 = vmul.f32 %v1540_v23, %v235_v39  ;;  %1327 = vrsqrt.f32 %v211_v38 }
 0x152   :  { %v1316_v53 = vpop.eup %1315  ;;  %v278_v27 = vadd.f32 %v1547_v34, %v256_v42  ;;  %v236_v54 = vmul.f32 %v1314_v47, %v1475_v28  ;;  %v212_v55 = vadd.f32 1e-05, %v196_v45  ;;  %v213_v21 = vadd.f32 1e-05, %v197_v46 }
 0x153   :  { %v237_v56 = vmul.f32 %v1316_v53, %v1481_v35  ;;  %v180_v57 = vpop.xlane.xlu1 %179  ;;  %v182_v58 = vpop.xlane.xlu0 %181  ;;  %v279_v28 = vadd.f32 %v1547_v34, %v257_v50 }
 0x154   :  { %v1167_v61 = vpack.c.bf16 %v278_v27, %v277_v49  ;;  %v258_v62 = vmul.f32 %v1540_v23, %v236_v54  ;;  %1329 = vrsqrt.f32 %v212_v55  ;;  %v198_v63 = vmul.f32 0.0078125, %v180_v57 }
 0x155   :  { %v1318_v0 = vpop.eup %1317  ;;  %v259_v1 = vmul.f32 %v1540_v23, %v237_v56  ;;  %1331 = vrsqrt.f32 %v213_v21  ;;  %v199_v2 = vmul.f32 0.0078125, %v182_v58 }
 0x156   :  { %v1320_v3 = vpop.eup %1319  ;;  %1168 = vst [vmem:[#allocation2] sm:$0xff] %v1167_v61   ;;  %v280_v4 = vadd.f32 %v1547_v34, %v258_v62  ;;  %v238_v35 = vmul.f32 %v1318_v0, %v1483_v36  ;;  %v214_v7 = vadd.f32 1e-05, %v198_v63 }
 0x157   :  { %v239_v8 = vmul.f32 %v1320_v3, %v1489_v43  ;;  %v215_v9 = vadd.f32 1e-05, %v199_v2  ;;  %v184_v10 = vpop.xlane.xlu1 %183  ;;  %v281_v19 = vadd.f32 %v1547_v34, %v259_v1 }
 0x158   :  { %v1172_v11 = vpack.c.bf16 %v280_v4, %v279_v28  ;;  %v260_v16 = vmul.f32 %v1540_v23, %v238_v35  ;;  %1333 = vrsqrt.f32 %v214_v7  ;;  %v200_v17 = vmul.f32 0.0078125, %v184_v10  ;;  %v421_v10 = vld [vmem:[%s1669_s4] sm:$0x7]  ;;  %s1412_s4 = smov [#allocation8]  }
 0x159   :  { %v1322_v18 = vpop.eup %1321  ;;  %1335 = vrsqrt.f32 %v215_v9  ;;  %v261_v36 = vmul.f32 %v1540_v23, %v239_v8  ;;  %s1021_s9 = sshll.u32 %s1412_s4, 4  ;;  %s1022_s9 = int_to_ptr.vmem [resolvable:$true] %s1021_s9 }
 0x15a   :  { %v1324_v22 = vpop.eup %1323  ;;  %1204 = vst [vmem:[#allocation2 + $0x8] sm:$0xff] %v1172_v11   ;;  %v282_v24 = vadd.f32 %v1547_v34, %v260_v16  ;;  %v240_v25 = vmul.f32 %v1322_v18, %v1491_v44  ;;  %v216_v43 = vadd.f32 1e-05, %v200_v17  ;;  %s1379_s10 = scalar_lea.vmem %s1022_s9, 3072  ;;  %p1384_p11 = scmp.lt.s32.totalorder %s1022_s9, %s1022_s9 }
 0x15b   :  { %v241_v26 = vmul.f32 %v1324_v22, %v1497_v51  ;;  %v283_v32 = vadd.f32 %v1547_v34, %v261_v36  ;;  %p1380_p10 = scmp.ne.s32.totalorder %s1022_s9, %s1379_s10  ;;  %p1385_p12 = scmp.lt.s32.totalorder %s1379_s10, %s1379_s10 }
 0x15c   :  { %v1177_v14 = vpack.c.bf16 %v282_v24, %v281_v19  ;;  %v262_v15 = vmul.f32 %v1540_v23, %v240_v25  ;;  %1337 = vrsqrt.f32 %v216_v43 }
 0x15d   :  { %v1326_v29 = vpop.eup %1325  ;;  %v1298_v30 = vld [vmem:[#allocation2] sm:$0xff]   ;;  %v263_v37 = vmul.f32 %v1540_v23, %v241_v26  ;;  %p1386_p13 = por %p1385_p12, %p1384_p11 }
 0x15e   :  { %v1328_v31 = vpop.eup %1327  ;;  %1205 = vst [vmem:[#allocation2 + $0x10] sm:$0xff] %v1177_v14   ;;  %v284_v33 = vadd.f32 %v1547_v34, %v262_v15  ;;  %v242_v20 = vmul.f32 %v1326_v29, %v1499_v52  ;;  %647 = vmatmul.mubr.bf16.vlgmr.msra.gmra.mxu0 %v1298_v30  ;;  %1243 = vmatprep.mubr.bf16.mxu1 %v1298_v30 }
 0x15f   :  { %v243_v44 = vmul.f32 %v1328_v31, %v1505_v59  ;;  %656 = vmatprep.mubr.bf16.mxu0 %v1411_v48  ;;  %v285_v42 = vadd.f32 %v1547_v34, %v263_v37  ;;  %p1387_p0 = pnand %p1386_p13, %p1380_p10 }
 0x160   :  { %v1182_v51 = vpack.c.bf16 %v284_v33, %v283_v32  ;;  %v264_v38 = vmul.f32 %v1540_v23, %v242_v20 }
 0x161   :  { %v1330_v39 = vpop.eup %1329  ;;  %v1300_v40 = vld [vmem:[#allocation2 + $0x8] sm:$0xff]   ;;  %v265_v46 = vmul.f32 %v1540_v23, %v243_v44 }
 0x162   :  { %v1332_v41 = vpop.eup %1331  ;;  %1206 = vst [vmem:[#allocation2 + $0x18] sm:$0xff] %v1182_v51   ;;  %v286_v45 = vadd.f32 %v1547_v34, %v264_v38  ;;  %v244_v52 = vmul.f32 %v1330_v39, %v1508_v60  ;;  %1244 = vmatmul.mubr.bf16.vlgmr.msra.gmra.mxu1 %v1300_v40 }
 0x163   :  { %v245_v59 = vmul.f32 %v1332_v41, %v1515_v5  ;;  %v287_v54 = vadd.f32 %v1547_v34, %v265_v46 }
 0x164   :  { %v1187_v47 = vpack.c.bf16 %v286_v45, %v285_v42  ;;  %v266_v49 = vmul.f32 %v1540_v23, %v244_v52 }
 0x165   :  { %v1334_v50 = vpop.eup %1333  ;;  %v1301_v53 = vld [vmem:[#allocation2 + $0x10] sm:$0xff]   ;;  %v267_v21 = vmul.f32 %v1540_v23, %v245_v59 }
 0x166   :  { %v1336_v27 = vpop.eup %1335  ;;  %1207 = vst [vmem:[#allocation2 + $0x20] sm:$0xff] %v1187_v47   ;;  %v288_v55 = vadd.f32 %v1547_v34, %v266_v49  ;;  %v246_v56 = vmul.f32 %v1334_v50, %v1518_v6  ;;  %657 = vmatmul.mubr.bf16.gmra.mxu0 %v1300_v40  ;;  %1247 = vmatprep.mubr.bf16.mxu1 %v1301_v53 }
 0x167   :  { %v247_v60 = vmul.f32 %v1336_v27, %v1525_v12  ;;  %666 = vmatprep.mubr.bf16.mxu0 %v1411_v48  ;;  %v289_v62 = vadd.f32 %v1547_v34, %v267_v21 }
 0x168   :  { %v1192_v5 = vpack.c.bf16 %v288_v55, %v287_v54  ;;  %v268_v57 = vmul.f32 %v1540_v23, %v246_v56 }
 0x169   :  { %v1338_v58 = vpop.eup %1337  ;;  %v1302_v61 = vld [vmem:[#allocation2 + $0x18] sm:$0xff]   ;;  %v269_v0 = vmul.f32 %v1540_v23, %v247_v60 }
 0x16a   :  { %1208 = vst [vmem:[#allocation2 + $0x28] sm:$0xff] %v1192_v5   ;;  %v290_v63 = vadd.f32 %v1547_v34, %v268_v57  ;;  %v248_v6 = vmul.f32 %v1338_v58, %v1528_v13  ;;  %1248 = vmatmul.mubr.bf16.gmra.mxu1 %v1302_v61 }
 0x16b   :  { %v291_v3 = vadd.f32 %v1547_v34, %v269_v0 }
 0x16c   :  { %v1197_v12 = vpack.c.bf16 %v290_v63, %v289_v62  ;;  %v270_v1 = vmul.f32 %v1540_v23, %v248_v6  ;;  %v423_v23 = vlaneseq }
 0x16d   :  { %v1303_v2 = vld [vmem:[#allocation2 + $0x20] sm:$0xff]  }
 0x16e   :  { %1209 = vst [vmem:[#allocation2 + $0x30] sm:$0xff] %v1197_v12   ;;  %v292_v28 = vadd.f32 %v1547_v34, %v270_v1  ;;  %667 = vmatmul.mubr.bf16.gmra.mxu0 %v1301_v53  ;;  %1251 = vmatprep.mubr.bf16.mxu1 %v1303_v2  ;;  %v424_v34 = vshrl.u32 %v423_v23, 7 }
 0x16f   :  { %676 = vmatprep.mubr.bf16.mxu0 %v1411_v48 }
 0x170   :  { %v1202_v4 = vpack.c.bf16 %v292_v28, %v291_v3  ;;  %v425_v8 = vsub.s32 0, %v424_v34  ;;  %v429_v9 = vsub.s32 1, %v424_v34  ;;  %v433_v11 = vsub.s32 2, %v424_v34 }
 0x171   :  { %v1304_v35 = vld [vmem:[#allocation2 + $0x28] sm:$0xff]  }
 0x172   :  { %1210 = vst [vmem:[#allocation2 + $0x38] sm:$0xff] %v1202_v4   ;;  %1252 = vmatmul.mubr.bf16.gmra.mxu1 %v1304_v35  ;;  %v1605_v16 = vrot.slane %v421_v10, %v425_v8  ;;  %v1607_v17 = vrot.slane %v421_v10, %v429_v9  ;;  %v1609_v19 = vrot.slane %v421_v10, %v433_v11 }
 0x175   :  { %v1305_v7 = vld [vmem:[#allocation2 + $0x30] sm:$0xff]  }
 0x176   :  { %677 = vmatmul.mubr.bf16.gmra.mxu0 %v1302_v61  ;;  %1255 = vmatprep.mubr.bf16.mxu1 %v1305_v7 }
 0x177   :  { %686 = vmatprep.mubr.bf16.mxu0 %v1411_v48 }
 0x179   :  { %v1306_v13 = vld [vmem:[#allocation2 + $0x38] sm:$0xff]  }
 0x17a   :  { %1256 = vmatmul.mubr.bf16.gmra.mxu1 %v1306_v13 }
 0x17e   :  { %687 = vmatmul.mubr.bf16.gmra.mxu0 %v1303_v2 }
 0x17f   :  { %696 = vmatprep.mubr.bf16.mxu0 %v1411_v48 }
 0x186   :  { %697 = vmatmul.mubr.bf16.gmra.mxu0 %v1304_v35 }
 0x187   :  { %706 = vmatprep.mubr.bf16.mxu0 %v1411_v48 }
 0x18e   :  { %707 = vmatmul.mubr.bf16.gmra.mxu0 %v1305_v7 }
 0x18f   :  { %716 = vmatprep.mubr.bf16.mxu0 %v1411_v48 }
 0x196   :  { %717 = vmatmul.mubr.bf16.gmra.mxu0 %v1306_v13 }
 0x21e   :  { %v648_v18 = vpop.f32.mrf.mxu0 }
 0x21f   :  { %v649_v48 = vadd.f32 %v648_v18, %v1605_v16 }
 0x220   :  { %v650_v22 = vpop.f32.mrf.mxu0 }
 0x221   :  { %v651_v24 = vadd.f32 %v650_v22, %v1607_v17 }
 0x222   :  { %v652_v36 = vpop.f32.mrf.mxu0  ;;  %v1245_v25 = vpop.f32.mrf.mxu1 }
 0x223   :  { %v1132_v43 = vpack.c.bf16 %v651_v24, %v649_v48  ;;  %v770_v26 = vadd.f32 %v1245_v25, %v1609_v19  ;;  %v653_v29 = vadd.f32 %v652_v36, %v1605_v16 }
 0x224   :  { %v654_v14 = vpop.f32.mrf.mxu0  ;;  %v761_v15 = vpop.f32.mrf.mxu1 }
 0x225   :  { %984 = vst [vmem:[#allocation8] sm:$0xff] %v1132_v43  ;;  %v1137_v30 = vpack.c.bf16 %v770_v26, %v770_v26  ;;  %v655_v31 = vadd.f32 %v654_v14, %v1607_v17  ;;  %v762_v32 = vadd.f32 %v761_v15, %v1609_v19 }
 0x226   :  { %v658_v33 = vpop.f32.mrf.mxu0  ;;  %v1246_v37 = vpop.f32.mrf.mxu1 }
 0x227   :  { %989 = vst [vmem:[#allocation8 + $0x20] sm:$0xf] %v1137_v30  ;;  %v1134_v20 = vpack.c.bf16 %v655_v31, %v653_v29  ;;  %v1133_v44 = vpack.c.bf16 %v762_v32, %v762_v32  ;;  %v773_v51 = vadd.f32 %v1246_v37, %v1609_v19  ;;  %v659_v40 = vadd.f32 %v658_v33, %v1605_v16 }
 0x228   :  { %v660_v38 = vpop.f32.mrf.mxu0  ;;  %v764_v39 = vpop.f32.mrf.mxu1 }
 0x229   :  { %986 = vst [vmem:[#allocation8 + $0xc] sm:$0xff] %v1134_v20  ;;  %985 = vst [vmem:[#allocation8 + $0x8] sm:$0xf] %v1133_v44  ;;  %v1139_v41 = vpack.c.bf16 %v773_v51, %v773_v51  ;;  %v661_v42 = vadd.f32 %v660_v38, %v1607_v17  ;;  %v765_v45 = vadd.f32 %v764_v39, %v1609_v19 }
 0x22a   :  { %v662_v46 = vpop.f32.mrf.mxu0  ;;  %v1249_v52 = vpop.f32.mrf.mxu1 }
 0x22b   :  { %991 = vst [vmem:[#allocation8 + $0x2c] sm:$0xf] %v1139_v41  ;;  %v1136_v59 = vpack.c.bf16 %v661_v42, %v659_v40  ;;  %v1135_v47 = vpack.c.bf16 %v765_v45, %v765_v45  ;;  %v786_v49 = vadd.f32 %v1249_v52, %v1609_v19  ;;  %v663_v27 = vadd.f32 %v662_v46, %v1605_v16 }
 0x22c   :  { %v664_v50 = vpop.f32.mrf.mxu0  ;;  %v777_v53 = vpop.f32.mrf.mxu1 }
 0x22d   :  { %988 = vst [vmem:[#allocation8 + $0x18] sm:$0xff] %v1136_v59  ;;  %987 = vst [vmem:[#allocation8 + $0x14] sm:$0xf] %v1135_v47  ;;  %v1145_v54 = vpack.c.bf16 %v786_v49, %v786_v49  ;;  %v665_v55 = vadd.f32 %v664_v50, %v1607_v17  ;;  %v778_v21 = vadd.f32 %v777_v53, %v1609_v19 }
 0x22e   :  { %v668_v56 = vpop.f32.mrf.mxu0  ;;  %v1250_v60 = vpop.f32.mrf.mxu1 }
 0x22f   :  { %997 = vst [vmem:[#allocation8 + $0x50] sm:$0xf] %v1145_v54  ;;  %v1138_v5 = vpack.c.bf16 %v665_v55, %v663_v27  ;;  %v1141_v57 = vpack.c.bf16 %v778_v21, %v778_v21  ;;  %v789_v58 = vadd.f32 %v1250_v60, %v1609_v19  ;;  %v669_v63 = vadd.f32 %v668_v56, %v1605_v16 }
 0x230   :  { %v670_v61 = vpop.f32.mrf.mxu0  ;;  %v780_v62 = vpop.f32.mrf.mxu1 }
 0x231   :  { %990 = vst [vmem:[#allocation8 + $0x24] sm:$0xff] %v1138_v5  ;;  %993 = vst [vmem:[#allocation8 + $0x38] sm:$0xf] %v1141_v57  ;;  %v1147_v0 = vpack.c.bf16 %v789_v58, %v789_v58  ;;  %v671_v6 = vadd.f32 %v670_v61, %v1607_v17  ;;  %v781_v12 = vadd.f32 %v780_v62, %v1609_v19 }
 0x232   :  { %v672_v1 = vpop.f32.mrf.mxu0  ;;  %v1253_v2 = vpop.f32.mrf.mxu1 }
 0x233   :  { %999 = vst [vmem:[#allocation8 + $0x5c] sm:$0xf] %v1147_v0  ;;  %v1140_v3 = vpack.c.bf16 %v671_v6, %v669_v63  ;;  %v1143_v28 = vpack.c.bf16 %v781_v12, %v781_v12  ;;  %v802_v4 = vadd.f32 %v1253_v2, %v1609_v19  ;;  %v673_v13 = vadd.f32 %v672_v1, %v1605_v16 }
 0x234   :  { %v674_v35 = vpop.f32.mrf.mxu0  ;;  %v793_v7 = vpop.f32.mrf.mxu1 }
 0x235   :  { %992 = vst [vmem:[#allocation8 + $0x30] sm:$0xff] %v1140_v3  ;;  %995 = vst [vmem:[#allocation8 + $0x44] sm:$0xf] %v1143_v28  ;;  %v1153_v23 = vpack.c.bf16 %v802_v4, %v802_v4  ;;  %v675_v34 = vadd.f32 %v674_v35, %v1607_v17  ;;  %v794_v8 = vadd.f32 %v793_v7, %v1609_v19 }
 0x236   :  { %v678_v9 = vpop.f32.mrf.mxu0  ;;  %v1254_v10 = vpop.f32.mrf.mxu1 }
 0x237   :  { %1005 = vst [vmem:[#allocation8 + $0x80] sm:$0xf] %v1153_v23  ;;  %v1142_v11 = vpack.c.bf16 %v675_v34, %v673_v13  ;;  %v1149_v18 = vpack.c.bf16 %v794_v8, %v794_v8  ;;  %v805_v22 = vadd.f32 %v1254_v10, %v1609_v19  ;;  %v679_v36 = vadd.f32 %v678_v9, %v1605_v16 }
 0x238   :  { %v680_v48 = vpop.f32.mrf.mxu0  ;;  %v796_v24 = vpop.f32.mrf.mxu1 }
 0x239   :  { %994 = vst [vmem:[#allocation8 + $0x3c] sm:$0xff] %v1142_v11  ;;  %1001 = vst [vmem:[#allocation8 + $0x68] sm:$0xf] %v1149_v18  ;;  %v1155_v25 = vpack.c.bf16 %v805_v22, %v805_v22  ;;  %v681_v43 = vadd.f32 %v680_v48, %v1607_v17  ;;  %v797_v26 = vadd.f32 %v796_v24, %v1609_v19 }
 0x23a   :  { %v682_v14 = vpop.f32.mrf.mxu0  ;;  %v1257_v15 = vpop.f32.mrf.mxu1 }
 0x23b   :  { %1007 = vst [vmem:[#allocation8 + $0x8c] sm:$0xf] %v1155_v25  ;;  %v1144_v29 = vpack.c.bf16 %v681_v43, %v679_v36  ;;  %v1151_v30 = vpack.c.bf16 %v797_v26, %v797_v26  ;;  %v818_v31 = vadd.f32 %v1257_v15, %v1609_v19  ;;  %v683_v37 = vadd.f32 %v682_v14, %v1605_v16 }
 0x23c   :  { %v684_v32 = vpop.f32.mrf.mxu0  ;;  %v809_v33 = vpop.f32.mrf.mxu1 }
 0x23d   :  { %996 = vst [vmem:[#allocation8 + $0x48] sm:$0xff] %v1144_v29  ;;  %1003 = vst [vmem:[#allocation8 + $0x74] sm:$0xf] %v1151_v30  ;;  %v1161_v20 = vpack.c.bf16 %v818_v31, %v818_v31  ;;  %v685_v44 = vadd.f32 %v684_v32, %v1607_v17  ;;  %v810_v51 = vadd.f32 %v809_v33, %v1609_v19 }
 0x23e   :  { %v688_v38 = vpop.f32.mrf.mxu0  ;;  %v1258_v39 = vpop.f32.mrf.mxu1 }
 0x23f   :  { %1013 = vst [vmem:[#allocation8 + $0xb0] sm:$0xf] %v1161_v20  ;;  %v1146_v40 = vpack.c.bf16 %v685_v44, %v683_v37  ;;  %v1157_v41 = vpack.c.bf16 %v810_v51, %v810_v51  ;;  %v821_v42 = vadd.f32 %v1258_v39, %v1609_v19  ;;  %v689_v52 = vadd.f32 %v688_v38, %v1605_v16 }
 0x240   :  { %v690_v45 = vpop.f32.mrf.mxu0  ;;  %v812_v46 = vpop.f32.mrf.mxu1 }
 0x241   :  { %998 = vst [vmem:[#allocation8 + $0x54] sm:$0xff] %v1146_v40  ;;  %1009 = vst [vmem:[#allocation8 + $0x98] sm:$0xf] %v1157_v41  ;;  %v1163_v59 = vpack.c.bf16 %v821_v42, %v821_v42  ;;  %v691_v47 = vadd.f32 %v690_v45, %v1607_v17  ;;  %v813_v49 = vadd.f32 %v812_v46, %v1609_v19 }
 0x242   :  { %v692_v50 = vpop.f32.mrf.mxu0 }
 0x243   :  { %1015 = vst [vmem:[#allocation8 + $0xbc] sm:$0xf] %v1163_v59  ;;  %v1148_v53 = vpack.c.bf16 %v691_v47, %v689_v52  ;;  %v1159_v27 = vpack.c.bf16 %v813_v49, %v813_v49  ;;  %v693_v55 = vadd.f32 %v692_v50, %v1605_v16 }
 0x244   :  { %v694_v54 = vpop.f32.mrf.mxu0 }
 0x245   :  { %1000 = vst [vmem:[#allocation8 + $0x60] sm:$0xff] %v1148_v53  ;;  %1011 = vst [vmem:[#allocation8 + $0xa4] sm:$0xf] %v1159_v27  ;;  %v695_v21 = vadd.f32 %v694_v54, %v1607_v17 }
 0x246   :  { %v698_v56 = vpop.f32.mrf.mxu0 }
 0x247   :  { %v1150_v60 = vpack.c.bf16 %v695_v21, %v693_v55  ;;  %v699_v57 = vadd.f32 %v698_v56, %v1605_v16 }
 0x248   :  { %v700_v5 = vpop.f32.mrf.mxu0 }
 0x249   :  { %1002 = vst [vmem:[#allocation8 + $0x6c] sm:$0xff] %v1150_v60  ;;  %v701_v58 = vadd.f32 %v700_v5, %v1607_v17 }
 0x24a   :  { %v702_v19 = vpop.f32.mrf.mxu0 }
 0x24b   :  { %v1152_v61 = vpack.c.bf16 %v701_v58, %v699_v57  ;;  %v703_v63 = vadd.f32 %v702_v19, %v1605_v16 }
 0x24c   :  { %v704_v62 = vpop.f32.mrf.mxu0 }
 0x24d   :  { %1004 = vst [vmem:[#allocation8 + $0x78] sm:$0xff] %v1152_v61  ;;  %v705_v0 = vadd.f32 %v704_v62, %v1607_v17 }
 0x24e   :  { %v708_v6 = vpop.f32.mrf.mxu0 }
 0x24f   :  { %v1154_v12 = vpack.c.bf16 %v705_v0, %v703_v63  ;;  %v709_v2 = vadd.f32 %v708_v6, %v1605_v16 }
 0x250   :  { %v710_v1 = vpop.f32.mrf.mxu0 }
 0x251   :  { %1006 = vst [vmem:[#allocation8 + $0x84] sm:$0xff] %v1154_v12  ;;  %v711_v3 = vadd.f32 %v710_v1, %v1607_v17 }
 0x252   :  { %v712_v28 = vpop.f32.mrf.mxu0 }
 0x253   :  { %v1156_v4 = vpack.c.bf16 %v711_v3, %v709_v2  ;;  %v713_v7 = vadd.f32 %v712_v28, %v1605_v16 }
 0x254   :  { %v714_v35 = vpop.f32.mrf.mxu0 }
 0x255   :  { %1008 = vst [vmem:[#allocation8 + $0x90] sm:$0xff] %v1156_v4  ;;  %v715_v13 = vadd.f32 %v714_v35, %v1607_v17 }
 0x256   :  { %v718_v23 = vpop.f32.mrf.mxu0 }
 0x257   :  { %v1158_v34 = vpack.c.bf16 %v715_v13, %v713_v7  ;;  %v719_v9 = vadd.f32 %v718_v23, %v1605_v16 }
 0x258   :  { %v720_v8 = vpop.f32.mrf.mxu0 }
 0x259   :  { %1010 = vst [vmem:[#allocation8 + $0x9c] sm:$0xff] %v1158_v34  ;;  %v721_v10 = vadd.f32 %v720_v8, %v1607_v17 }
 0x25a   :  { %v722_v11 = vpop.f32.mrf.mxu0 }
 0x25b   :  { %v1160_v18 = vpack.c.bf16 %v721_v10, %v719_v9  ;;  %v723_v48 = vadd.f32 %v722_v11, %v1605_v16 }
 0x25c   :  { %v724_v22 = vpop.f32.mrf.mxu0 }
 0x25d   :  { %1012 = vst [vmem:[#allocation8 + $0xa8] sm:$0xff] %v1160_v18  ;;  %v725_v24 = vadd.f32 %v724_v22, %v1607_v17 }
 0x25f   :  { %v1162_v36 = vpack.c.bf16 %v725_v24, %v723_v48 }
 0x261   :  { %1014 = vst [vmem:[#allocation8 + $0xb4] sm:$0xff] %v1162_v36 }
 0x262   :  { %1390 = shalt.err (!%p1387_p0)
}
 0x263   :  { %1027 = dma.vmem_to_hbm [thread:$0]  %s1022_s9, 3072, %s1670_s5, [#allocation5], %s1409_s28, %s1409_s28, %s1410_s29  }
 0x264   :  { %1403 = dma.done.wait [#allocation5], 3072  }
 0x265   :  { %1404 = vsyncadd [#allocation5], 4294964224 }
 0x266   :  { %1031 = vsyncpa [#allocation4], 1 }
 0x267   :  { %1032 = vsyncpa [#allocation7], 1 }
 0x268   :  { %1033 = vsyncpa [#allocation5], 1 }

</bundles_post_ra>
